<compile_context>
chip_gen: v5e
topology: v5e:2x2
jax: 0.10.0
libtpu: 0.0.40
codegen_flags: <defaults>
</compile_context>

<pallas_src>
import jax
import jax.numpy as jnp
from jax.experimental import pallas as pl
from jax.experimental.pallas import tpu as pltpu

INPUT_DIM = 32
HIDDEN = 50
NB_CLASSES = 10
N_FC2_REPEATS = 20
W_PAD_LANES = 128      # MXU-aligned padded width of the resident W operand
TM_MAX = 8192          # row tile; ~10 MiB VMEM double-buffered at this size


def _cdiv(a, b):
    return -(-a // b)


def _round_up(a, m):
    return _cdiv(a, m) * m


# ----------------------------------------------------------------------------- kernel
def fcn_kernel(x_ref, w_ref, b_ref, out_ref):
    # (tm, 32) @ (32, 128) on the MXU, f32 accumulate; store only the 10 real
    # lanes (narrow masked store is fully hidden — this kernel is HBM-bound).
    acc = jnp.dot(x_ref[...], w_ref[...], preferred_element_type=jnp.float32)
    out_ref[...] = acc[:, :NB_CLASSES] + b_ref[...]


# ------------------------------------------------------------------- param preparation
def collapse_affine(params):
    """Fold fc1 -> 20x fc2 -> fc3 (no activations) into one affine map."""
    w1, b1, w2, b2, w3, b3 = params          # weights stored as (in, out)
    W = w1                                   # (32, 50)
    b = b1                                   # (1, 50)
    for _ in range(N_FC2_REPEATS):
        W = W @ w2
        b = b @ w2 + b2
    W = W @ w3                               # (32, 10)
    b = b @ w3 + b3                          # (1, 10)
    return W, b


def prepare_params(params):
    """One-time (init / param-update) precompute: collapse + lane-pad W for the MXU."""
    w_eff, b_eff = collapse_affine(params)                              # (32,10), (1,10)
    w_pad = jnp.pad(w_eff, ((0, 0), (0, W_PAD_LANES - NB_CLASSES)))     # (32, 128)
    return w_pad.astype(jnp.float32), b_eff.astype(jnp.float32)


# -------------------------------------------------------------------------- forward
def _pick_tm(n):
    # >=2 grid steps when possible (v7x megacore), tiles as large as TM_MAX.
    tm = min(TM_MAX, _round_up(max(_cdiv(n, 2), 1), 8))
    return max(tm, 8)


def fcn_forward(x, w_pad, b_eff):
    """x: any shape whose elements flatten to rows of INPUT_DIM (PyTorch view(-1, input_dim))."""
    x2d = x.reshape(-1, INPUT_DIM).astype(jnp.float32)
    n = x2d.shape[0]
    tm = _pick_tm(n)
    grid = (_cdiv(n, tm),)   # partial last block handled by Pallas (output rows clipped)

    out = pl.pallas_call(
        fcn_kernel,
        out_shape=jax.ShapeDtypeStruct((n, NB_CLASSES), jnp.float32),
        grid_spec=pltpu.PrefetchScalarGridSpec(
            num_scalar_prefetch=0,
            grid=grid,
            in_specs=[
                pl.BlockSpec((tm, INPUT_DIM), lambda i: (i, 0)),          # x rows, tiled
                pl.BlockSpec((INPUT_DIM, W_PAD_LANES), lambda i: (0, 0)),  # W_eff, resident
                pl.BlockSpec((1, NB_CLASSES), lambda i: (0, 0)),           # b_eff, resident
            ],
            out_specs=pl.BlockSpec((tm, NB_CLASSES), lambda i: (i, 0)),    # narrow real-width output
        ),
        compiler_params=pltpu.CompilerParams(
            dimension_semantics=("parallel",),   # shard row tiles across v7x's 2 TCs
            vmem_limit_bytes=32 * 1024 * 1024,   # guardrail; ~10 MiB actually used at tm=8192
        ),
    )(x2d, w_pad, b_eff)

    return out


fcn_forward_jit = jax.jit(fcn_forward)


# ------------------------------------------------------------------------ init / reference
def init_params(key):
    """Deterministic init mimicking nn.Linear; weights stored transposed as (in, out)."""
    ks = jax.random.split(key, 6)

    def linear(kw, kb, fan_in, fan_out):
        bound = 1.0 / jnp.sqrt(fan_in)
        w = jax.random.uniform(kw, (fan_in, fan_out), jnp.float32, -bound, bound)
        b = jax.random.uniform(kb, (1, fan_out), jnp.float32, -bound, bound)
        return w, b

    w1, b1 = linear(ks[0], ks[1], INPUT_DIM, HIDDEN)
    w2, b2 = linear(ks[2], ks[3], HIDDEN, HIDDEN)
    w3, b3 = linear(ks[4], ks[5], HIDDEN, NB_CLASSES)
    return (w1, b1, w2, b2, w3, b3)


def fcn_reference(x, params):
    """Pure-JAX reference matching the PyTorch forward (full un-collapsed chain)."""
    w1, b1, w2, b2, w3, b3 = params
    h = x.reshape(-1, INPUT_DIM).astype(jnp.float32) @ w1 + b1
    for _ in range(N_FC2_REPEATS):
        h = h @ w2 + b2
    return h @ w3 + b3


if __name__ == "__main__":
    key = jax.random.PRNGKey(0)
    k_params, k_x = jax.random.split(key)
    params = init_params(k_params)

    # One-time collapse/pad (hoisted out of the per-call forward path).
    w_pad, b_eff = prepare_params(params)
    w_pad, b_eff = jax.block_until_ready((w_pad, b_eff))

    # (2, 4, 16, 16) = 2048 elements -> view(-1, 32) gives (64, 32) rows.
    # tm = 32 -> grid = (2,): exercises the multi-tile parallel grid.
    x = jax.random.normal(k_x, (2, 4, 16, 16), jnp.float32)
    out = jax.block_until_ready(fcn_forward_jit(x, w_pad, b_eff))
    ref = fcn_reference(x, params)
    assert out.shape == (x.size // INPUT_DIM, NB_CLASSES)
    assert jnp.allclose(out, ref, atol=2e-4, rtol=2e-4), "mismatch vs reference (small)"

    # Larger, non-multiple batch: tm = 624, grid = (2,), partial last block (no x padding).
    x_big = jax.random.normal(jax.random.PRNGKey(1), (1234, INPUT_DIM), jnp.float32)
    out_big = jax.block_until_ready(fcn_forward_jit(x_big, w_pad, b_eff))
    ref_big = fcn_reference(x_big, params)
    assert out_big.shape == (1234, NB_CLASSES)
    assert jnp.allclose(out_big, ref_big, atol=2e-4, rtol=2e-4), "mismatch vs reference (big)"

    print("KERNEL_OK")
</pallas_src>

<mosaic_0001>
module attributes {stable_mosaic.version = 11 : i64} {
  func.func @fcn_kernel(%arg0: i32, %arg1: memref<32x32xf32, #tpu.memory_space<vmem>>, %arg2: memref<32x128xf32, #tpu.memory_space<vmem>>, %arg3: memref<1x10xf32, #tpu.memory_space<vmem>>, %arg4: memref<32x10xf32, #tpu.memory_space<vmem>>) attributes {dimension_semantics = [#tpu.dimension_semantics<parallel>], iteration_bounds = array<i64: 2>, scalar_prefetch = 0 : i64, scratch_operands = 0 : i64, tpu.core_type = #tpu.core_type<tc>, window_params = [{transform_indices = @transform_0, window_bounds = array<i64: 32, 32>}, {pipeline_mode = #tpu.pipeline_mode<synchronous>, transform_indices = @transform_1, window_bounds = array<i64: 32, 128>}, {pipeline_mode = #tpu.pipeline_mode<synchronous>, transform_indices = @transform_2, window_bounds = array<i64: 1, 10>}, {transform_indices = @transform_3, window_bounds = array<i64: 32, 10>}]} {
    %c0 = arith.constant 0 : index
    %c0_0 = arith.constant 0 : index
    %0 = vector.load %arg1[%c0, %c0_0] : memref<32x32xf32, #tpu.memory_space<vmem>>, vector<32x32xf32>
    %c0_1 = arith.constant 0 : index
    %c0_2 = arith.constant 0 : index
    %1 = vector.load %arg2[%c0_1, %c0_2] : memref<32x128xf32, #tpu.memory_space<vmem>>, vector<32x128xf32>
    %cst = arith.constant dense<0.000000e+00> : vector<32x128xf32>
    %2 = tpu.matmul %0, %1, %cst {dimension_numbers = #tpu.dot_dimension_numbers<[1], [0], [0], [1], [0, 0, 1, 1], [], []>} : vector<32x32xf32>, vector<32x128xf32>, vector<32x128xf32> -> vector<32x128xf32>
    %3 = vector.extract_strided_slice %2 {offsets = [0, 0], sizes = [32, 10], strides = [1, 1]} : vector<32x128xf32> to vector<32x10xf32>
    %c0_3 = arith.constant 0 : index
    %c0_4 = arith.constant 0 : index
    %4 = vector.load %arg3[%c0_3, %c0_4] : memref<1x10xf32, #tpu.memory_space<vmem>>, vector<1x10xf32>
    %5 = vector.broadcast %4 : vector<1x10xf32> to vector<32x10xf32>
    %6 = arith.addf %3, %5 : vector<32x10xf32>
    %c0_5 = arith.constant 0 : index
    %c0_6 = arith.constant 0 : index
    %7 = vector.load %arg4[%c0_5, %c0_6] : memref<32x10xf32, #tpu.memory_space<vmem>>, vector<32x10xf32>
    tpu.vector_store %arg4[%c0_5, %c0_6], %6 {strides = array<i32>} : memref<32x10xf32, #tpu.memory_space<vmem>>, vector<32x10xf32>,
    return
  }
  func.func @transform_0(%arg0: i32) -> (i32, i32) {
    %c0_i32 = arith.constant 0 : i32
    %c0_i32_0 = arith.constant 0 : i32
    return %arg0, %c0_i32 : i32, i32
  }
  func.func @transform_1(%arg0: i32) -> (i32, i32) {
    %c0_i32 = arith.constant 0 : i32
    %c0_i32_0 = arith.constant 0 : i32
    %c0_i32_1 = arith.constant 0 : i32
    return %c0_i32, %c0_i32_0 : i32, i32
  }
  func.func @transform_2(%arg0: i32) -> (i32, i32) {
    %c0_i32 = arith.constant 0 : i32
    %c0_i32_0 = arith.constant 0 : i32
    %c0_i32_1 = arith.constant 0 : i32
    return %c0_i32, %c0_i32_0 : i32, i32
  }
  func.func @transform_3(%arg0: i32) -> (i32, i32) {
    %c0_i32 = arith.constant 0 : i32
    %c0_i32_0 = arith.constant 0 : i32
    return %arg0, %c0_i32 : i32, i32
  }
}

</mosaic_0001>

<bundles_post_ra>
// kernel: fcn_forward.1
= control target key start
LH: loop header
LB: loop body
LE: loop exit
PB: predicated region body
PF: predicated region fallthrough
CT: control target
= control target key end

     0   :  { %s357_s12 = smov 0   ;;  %s389_s0 = inlined_call_operand.vmem [shape: f32[64,32], index: 0, kind: input, shape index: {}]   ;;  %s390_s1 = inlined_call_operand.vmem [shape: f32[32,128], index: 1, kind: input, shape index: {}]   ;;  %s391_s2 = inlined_call_operand.vmem [shape: f32[1,10], index: 2, kind: input, shape index: {}]   ;;  %s392_s3 = inlined_call_operand.vmem [shape: f32[64,10], index: 3, kind: output, shape index: {}]  }
   0x1 LB: > { %s293_s13 = sadd.s32 4294967295, %s335_s12   ;;  %p297_p0 = scmp.ge.s32.totalorder %s335_s12, 1  ;;  %s335_s12 = sphi %s357_s12, %s13_s12  }
   0x2   : > { %p138_p1 = scmp.lt.s32.totalorder %s335_s12, 3 }
   0x4   : > { %p139_p2 = pnand %p297_p0, %p138_p1 }
   0x5   : > { %s298_s18 = sshll.u32 (!%p139_p2), %s293_s13, 2 }
   0x6   : > { %142 = sbr.rel (%p139_p2) target bundleno = 155 (0x9b), region = 32  ;;  %p163_p3 = scmp.lt.s32.totalorder (!%p139_p2), %s298_s18, 7 }
   0xb   : > { %v181_v0 = vld [vmem:[%s390_s1 + $0x18] sm:$0xff]  ;;  %v180_v1 = vld [vmem:[%s390_s1 + $0x10] sm:$0xff]  ;;  %v179_v2 = vld [vmem:[%s390_s1 + $0x8] sm:$0xff]  ;;  %s394_s18 = smov (!%p163_p3, %s298_s18), 7  ;;  %vm182_vm0 = vcmask 261120   ;;  %vm232_vm1 = vcmask 80896  }
   0xc   : > { %309 = vmatpush.msra.mxu2 %v181_v0  ;;  %310 = vmatpush.msra.mxu3 %v181_v0  ;;  %v178_v3 = vld [vmem:[%s390_s1] sm:$0xff]  ;;  %s299_s23 = sshll.u32 %s394_s18, 3 }
   0xd   : > { %207 = vmatpush.msra.mxu0 %v181_v0  ;;  %308 = vmatpush.msra.mxu1 %v181_v0  ;;  %s166_s26 = scalar_lea.vmem %s389_s0, %s299_s23  ;;  %v328_v8 = vld [vmem:[%s391_s2] ss:$0 sm:$0xff]  ;;  %s172_s4 = scalar_lea.vmem %s392_s3, %s299_s23 }
   0xe   : > { %312 = vmatpush.msra.mxu2 %v180_v1  ;;  %313 = vmatpush.msra.mxu3 %v180_v1  ;;  %v176_v4 = vld [vmem:[%s166_s26 + $0x10] sm:$0xff]  ;;  %v177_v5 = vld [vmem:[%s166_s26 + $0x18] sm:$0xff]  ;;  %v174_v6 = vld [vmem:[%s166_s26] sm:$0xff] }
   0xf   : > { %208 = vmatpush.msra.mxu0 %v180_v1  ;;  %311 = vmatpush.msra.mxu1 %v180_v1  ;;  %v175_v7 = vld [vmem:[%s166_s26 + $0x8] sm:$0xff] }
  0x10   : > { %315 = vmatpush.msra.mxu2 %v179_v2  ;;  %316 = vmatpush.msra.mxu3 %v179_v2 }
  0x11   : > { %209 = vmatpush.msra.mxu0 %v179_v2  ;;  %314 = vmatpush.msra.mxu1 %v179_v2 }
  0x12   : > { %318 = vmatpush.msra.mxu2 %v178_v3  ;;  %319 = vmatpush.msra.mxu3 %v178_v3 }
  0x13   : > { %304 = vmatmul.msk.f32.vlgmr.msra.gmra.mxu2 %vm182_vm0, %v176_v4  ;;  %305 = vmatmul.msk.f32.vlgmr.msra.gmra.mxu3 %vm182_vm0, %v177_v5 }
  0x14   : > { %210 = vmatpush.msra.mxu0 %v178_v3  ;;  %317 = vmatpush.msra.mxu1 %v178_v3 }
  0x15   : > { %302 = vmatmul.msk.f32.vlgmr.msra.gmra.mxu0 %vm182_vm0, %v174_v6  ;;  %303 = vmatmul.msk.f32.vlgmr.msra.gmra.mxu1 %vm182_vm0, %v175_v7 }
  0x92   : > { %v212_v9 = vpop.f32.mrf.mxu0  ;;  %v215_v10 = vpop.f32.mrf.mxu1 }
  0x93   : > { %v228_v11 = vadd.f32 %v328_v8, %v212_v9  ;;  %v229_v12 = vadd.f32 %v328_v8, %v215_v10 }
  0x95   : > { %233 = vst.msk [vmem:[%s172_s4] sm:$0xff] %vm232_vm1, %v228_v11 }
  0x96   : > { %234 = vst.msk [vmem:[%s172_s4 + $0x8] sm:$0xff] %vm232_vm1, %v229_v12  ;;  %v218_v13 = vpop.f32.mrf.mxu2  ;;  %v221_v14 = vpop.f32.mrf.mxu3 }
  0x97   : > { %v230_v15 = vadd.f32 %v328_v8, %v218_v13  ;;  %v231_v16 = vadd.f32 %v328_v8, %v221_v14 }
  0x99   : > { %235 = vst.msk [vmem:[%s172_s4 + $0x10] sm:$0xff] %vm232_vm1, %v230_v15 }
  0x9a   : > { %236 = vst.msk [vmem:[%s172_s4 + $0x18] sm:$0xff] %vm232_vm1, %v231_v16 }
  0x9b PF: > { %s13_s12 = sadd.s32 1, %s335_s12  }
  0x9c   : > { %p10_p4 = scmp.ge.s32.totalorder %s13_s12, 4  }
  0x9e   :  { %12 = sbr.rel (!%p10_p4) target bundleno = 1 (0x1), region = 62 }

</bundles_post_ra>
